<compile_context>
chip_gen: v5e
topology: v5e:2x2
jax: 0.10.0
libtpu: 0.0.40
codegen_flags: <defaults>
</compile_context>

<pallas_src>
import math

import jax
import jax.numpy as jnp
from jax import lax
from jax.experimental import pallas as pl
from jax.experimental.pallas import tpu as pltpu


def _meta_cognitive_kernel(
    mean_ref,   # (B, H)        mean_state for this grid step
    h0_ref,     # (B, H)        GRU initial hidden state for this grid step
    w_ref,      # (2H+M+1, 4H)  [W_mean ; W_h ; W_attn ; fused-bias] gate pack
    s_ref,      # (M+2, H)      [meta_state ; w_coh ; b_coh (lane-broadcast)]
    out_ref,    # (B+1, H)      rows 0:B = new hidden state, row B = coherence
):
    B, H = mean_ref.shape
    M = s_ref.shape[0] - 2

    mean = mean_ref[...]
    h0 = h0_ref[...]

    # --- bulk of the MXU work: independent of the softmax chain -------------
    w_mean = w_ref[0:H, :]                                   # (H, 4H)
    w_h = w_ref[H:2 * H, :]                                  # (H, 4H)
    g_big = (jnp.dot(mean, w_mean, preferred_element_type=jnp.float32)
             + jnp.dot(h0, w_h, preferred_element_type=jnp.float32))

    # --- attention over the learned meta states ------------------------------
    metas = s_ref[0:M, :]                                    # (M, H)
    scores = lax.dot_general(
        mean, metas, (((1,), (1,)), ((), ())),
        preferred_element_type=jnp.float32) * (1.0 / math.sqrt(H))
    scores = scores - jnp.max(scores, axis=-1, keepdims=True)
    e = jnp.exp(scores)
    attn = e / jnp.sum(e, axis=-1, keepdims=True)            # (B, M), exact

    # --- finish the fused GRU pre-activations (tiny K=M matmul on the chain) -
    w_attn = w_ref[2 * H:2 * H + M, :]                       # (M, 4H)
    b_all = w_ref[2 * H + M:2 * H + M + 1, :]                # (1, 4H)
    g = g_big + jnp.dot(attn, w_attn, preferred_element_type=jnp.float32) + b_all

    # --- GRU gates (PyTorch order r, z, n); 32-lane column blocks of g -------
    # (static lane slices lower to XLU shifts, off the VALU slot)
    r = jax.nn.sigmoid(g[:, 0:H])
    z = jax.nn.sigmoid(g[:, H:2 * H])
    n = jnp.tanh(g[:, 2 * H:3 * H] + r * g[:, 3 * H:4 * H])
    h_new = (1.0 - z) * n + z * h0
    out_ref[0:B, :] = h_new

    # --- coherence = sigmoid(mean_over_batch(mean @ w_coh^T + b_coh)) --------
    # VPU multiply + lane reduce instead of a 1-lane-wide MXU matmul; folded
    # into a spare output row instead of its own (8,128)-padded VMEM output.
    w_coh = s_ref[M:M + 1, :]                                # (1, H)
    b_coh = s_ref[M + 1:M + 2, 0:1]                          # (1, 1)
    logits = jnp.sum(mean * w_coh, axis=-1, keepdims=True) + b_coh   # (B, 1)
    coh = jax.nn.sigmoid(jnp.mean(logits, keepdims=True))            # (1, 1)
    out_ref[B:B + 1, :] = jnp.broadcast_to(coh, (1, H))


def init_params(key, hidden_dim: int, n_meta_states: int):
    """Deterministic synthetic parameters matching the PyTorch module shapes."""
    ks = jax.random.split(key, 7)
    k = 1.0 / math.sqrt(hidden_dim)
    f32 = jnp.float32
    return {
        "meta_state": jax.random.normal(ks[0], (n_meta_states, hidden_dim), f32) * 0.02,
        # nn.GRU(hidden+n_meta, hidden): weight_ih_l0 (3H, H+M), weight_hh_l0 (3H, H)
        "w_ih": jax.random.uniform(ks[1], (3 * hidden_dim, hidden_dim + n_meta_states), f32, -k, k),
        "w_hh": jax.random.uniform(ks[2], (3 * hidden_dim, hidden_dim), f32, -k, k),
        "b_ih": jax.random.uniform(ks[3], (3 * hidden_dim,), f32, -k, k),
        "b_hh": jax.random.uniform(ks[4], (3 * hidden_dim,), f32, -k, k),
        # nn.Linear(hidden, 1)
        "w_coh": jax.random.uniform(ks[5], (1, hidden_dim), f32, -k, k),
        "b_coh": jax.random.uniform(ks[6], (1,), f32, -k, k),
    }


def prepare_params(params):
    """One-time repack of PyTorch-layout params into two kernel buffers.

    weights : (2H+M+1, 4H)  rows = [mean-part ; h-part ; attn-part ; bias],
              cols = fused gates [ r | z | gi_n | gh_n ].
    statics : (M+2, H)      rows = [meta_state ; w_coh ; b_coh broadcast].
    """
    f32 = jnp.float32
    w_ih = params["w_ih"].astype(f32)        # (3H, H+M), gate order [r, z, n]
    w_hh = params["w_hh"].astype(f32)        # (3H, H)
    b_ih = params["b_ih"].astype(f32)
    b_hh = params["b_hh"].astype(f32)
    three_h, in_dim = w_ih.shape
    H = three_h // 3
    M = in_dim - H

    zH = jnp.zeros((H, H), f32)
    zM = jnp.zeros((M, H), f32)
    w_mean = jnp.concatenate(
        [w_ih[0:H, 0:H].T, w_ih[H:2 * H, 0:H].T, w_ih[2 * H:3 * H, 0:H].T, zH],
        axis=1)                                              # (H, 4H)
    w_h = jnp.concatenate(
        [w_hh[0:H, :].T, w_hh[H:2 * H, :].T, zH, w_hh[2 * H:3 * H, :].T],
        axis=1)                                              # (H, 4H)
    w_attn = jnp.concatenate(
        [w_ih[0:H, H:H + M].T, w_ih[H:2 * H, H:H + M].T,
         w_ih[2 * H:3 * H, H:H + M].T, zM],
        axis=1)                                              # (M, 4H)
    b_all = jnp.concatenate(
        [b_ih[0:H] + b_hh[0:H], b_ih[H:2 * H] + b_hh[H:2 * H],
         b_ih[2 * H:3 * H], b_hh[2 * H:3 * H]])[None, :]     # (1, 4H)
    weights = jnp.concatenate([w_mean, w_h, w_attn, b_all], axis=0)

    statics = jnp.concatenate(
        [params["meta_state"].astype(f32),                   # (M, H)
         params["w_coh"].astype(f32),                        # (1, H)
         jnp.full((1, H), params["b_coh"][0], f32)],         # (1, H)
        axis=0)                                              # (M+2, H)

    return {"weights": weights, "statics": statics,
            "hidden_dim": H, "n_meta_states": M}


@jax.jit
def _forward_batched(mean_states, h0s, weights, statics):
    """T independent forward passes in ONE pallas_call; weights stay resident."""
    T, B, H = mean_states.shape
    M = statics.shape[0] - 2
    out = pl.pallas_call(
        _meta_cognitive_kernel,
        out_shape=jax.ShapeDtypeStruct((T, B + 1, H), jnp.float32),
        grid_spec=pltpu.PrefetchScalarGridSpec(
            num_scalar_prefetch=0,
            grid=(T,),
            in_specs=[
                pl.BlockSpec((None, B, H), lambda t: (t, 0, 0)),
                pl.BlockSpec((None, B, H), lambda t: (t, 0, 0)),
                # Constant block index -> stays VMEM-resident across steps.
                pl.BlockSpec((2 * H + M + 1, 4 * H), lambda t: (0, 0)),
                pl.BlockSpec((M + 2, H), lambda t: (0, 0)),
            ],
            out_specs=pl.BlockSpec((None, B + 1, H), lambda t: (t, 0, 0)),
        ),
        compiler_params=pltpu.CompilerParams(
            dimension_semantics=("parallel",)),   # v7x: 2 TCs split the steps
    )(mean_states, h0s, weights, statics)
    return out[:, :B, :], out[:, B, 0]


def lightweight_meta_cognitive_batched(mean_states, prepared, h0s=None):
    """mean_states: (T, B, H) of T independent forward calls; h0s: (T, B, H) or None."""
    T, B, H = mean_states.shape
    if h0s is None:
        h0s = jnp.zeros((T, B, H), jnp.float32)
    return _forward_batched(mean_states.astype(jnp.float32),
                            h0s.astype(jnp.float32),
                            prepared["weights"], prepared["statics"])


def lightweight_meta_cognitive(mean_state, prepared, hidden_state=None):
    """Single forward pass; returns a dict like the PyTorch module."""
    B, H = mean_state.shape
    # PyTorch h0 is (num_layers=1, B, H); silently falls back to zeros when the
    # batch dim does not match, same as the reference module.
    if hidden_state is not None and hidden_state.shape[1] == B:
        h0s = hidden_state[0].astype(jnp.float32)[None]
    else:
        h0s = None
    meta_out, coh = lightweight_meta_cognitive_batched(mean_state[None], prepared, h0s)
    return {
        "meta_state": meta_out[0],            # (B, H)
        "coherence_score": coh[0],            # scalar
        "hidden_state": meta_out,             # (1, B, H) == GRU h_n
    }


def _reference_forward(mean_state, params, hidden_state=None):
    """Pure-JAX reference mirroring the PyTorch module (fp32, highest precision)."""
    with jax.default_matmul_precision("highest"):
        H = params["w_ih"].shape[0] // 3
        B = mean_state.shape[0]
        attn = jax.nn.softmax(
            mean_state @ params["meta_state"].T / math.sqrt(H), axis=-1)
        x = jnp.concatenate([mean_state, attn], axis=-1)
        if hidden_state is not None and hidden_state.shape[1] == B:
            h = hidden_state[0]
        else:
            h = jnp.zeros((B, H), jnp.float32)
        gi = x @ params["w_ih"].T + params["b_ih"]
        gh = h @ params["w_hh"].T + params["b_hh"]
        r = jax.nn.sigmoid(gi[:, 0:H] + gh[:, 0:H])
        z = jax.nn.sigmoid(gi[:, H:2 * H] + gh[:, H:2 * H])
        n = jnp.tanh(gi[:, 2 * H:] + r * gh[:, 2 * H:])
        h_new = (1.0 - z) * n + z * h
        coh = jax.nn.sigmoid(jnp.mean(mean_state @ params["w_coh"].T + params["b_coh"]))
    return h_new, coh


if __name__ == "__main__":
    # Small shapes consistent with the module: batch=2, hidden=32, n_meta=8.
    B, H, M = 2, 32, 8
    key = jax.random.PRNGKey(0)
    k_param, k_mean, k_h0 = jax.random.split(key, 3)

    params = init_params(k_param, hidden_dim=H, n_meta_states=M)
    prepared = prepare_params(params)          # one-time repack (cached)
    mean_state = jax.random.normal(k_mean, (B, H), jnp.float32)
    hidden_state = jax.random.normal(k_h0, (1, B, H), jnp.float32)

    # Single-forward paths: without provided hidden state (h0 = 0) and with it.
    out0 = lightweight_meta_cognitive(mean_state, prepared)
    out1 = lightweight_meta_cognitive(mean_state, prepared, hidden_state)
    jax.block_until_ready((out0, out1))

    assert out0["meta_state"].shape == (B, H)
    assert out0["hidden_state"].shape == (1, B, H)
    assert out0["coherence_score"].shape == ()

    # Correctness vs pure-JAX reference.
    ref_m0, ref_c0 = _reference_forward(mean_state, params)
    ref_m1, ref_c1 = _reference_forward(mean_state, params, hidden_state)
    assert jnp.allclose(out0["meta_state"], ref_m0, atol=1e-4, rtol=1e-4)
    assert jnp.allclose(out0["coherence_score"], ref_c0, atol=1e-4, rtol=1e-4)
    assert jnp.allclose(out1["meta_state"], ref_m1, atol=1e-4, rtol=1e-4)
    assert jnp.allclose(out1["coherence_score"], ref_c1, atol=1e-4, rtol=1e-4)

    # Amortized path: T independent forwards in ONE pallas_call (grid over T,
    # weights resident, "parallel" axis for v7x's two TensorCores).
    T = 4
    mean_T = jax.random.normal(k_mean, (T, B, H), jnp.float32)
    meta_T, coh_T = lightweight_meta_cognitive_batched(mean_T, prepared)
    jax.block_until_ready((meta_T, coh_T))
    assert meta_T.shape == (T, B, H) and coh_T.shape == (T,)
    for t in range(T):
        rm, rc = _reference_forward(mean_T[t], params)
        assert jnp.allclose(meta_T[t], rm, atol=1e-4, rtol=1e-4)
        assert jnp.allclose(coh_T[t], rc, atol=1e-4, rtol=1e-4)

    print("KERNEL_OK")
</pallas_src>

<mosaic_0001>
module attributes {stable_mosaic.version = 11 : i64} {
  func.func @_meta_cognitive_kernel(%arg0: i32, %arg1: memref<1x2x32xf32, #tpu.memory_space<vmem>>, %arg2: memref<1x2x32xf32, #tpu.memory_space<vmem>>, %arg3: memref<73x128xf32, #tpu.memory_space<vmem>>, %arg4: memref<10x32xf32, #tpu.memory_space<vmem>>, %arg5: memref<1x3x32xf32, #tpu.memory_space<vmem>>) attributes {dimension_semantics = [#tpu.dimension_semantics<parallel>], iteration_bounds = array<i64: 1>, scalar_prefetch = 0 : i64, scratch_operands = 0 : i64, tpu.core_type = #tpu.core_type<tc>, window_params = [{transform_indices = @transform_0, window_bounds = array<i64: 1, 2, 32>}, {transform_indices = @transform_1, window_bounds = array<i64: 1, 2, 32>}, {pipeline_mode = #tpu.pipeline_mode<synchronous>, transform_indices = @transform_2, window_bounds = array<i64: 73, 128>}, {pipeline_mode = #tpu.pipeline_mode<synchronous>, transform_indices = @transform_3, window_bounds = array<i64: 10, 32>}, {transform_indices = @transform_4, window_bounds = array<i64: 1, 3, 32>}]} {
    %c0 = arith.constant 0 : index
    %c0_0 = arith.constant 0 : index
    %c0_1 = arith.constant 0 : index
    %0 = vector.load %arg1[%c0, %c0_0, %c0_1] : memref<1x2x32xf32, #tpu.memory_space<vmem>>, vector<1x2x32xf32>
    %1 = vector.shape_cast %0 : vector<1x2x32xf32> to vector<2x32xf32>
    %c0_2 = arith.constant 0 : index
    %c0_3 = arith.constant 0 : index
    %c0_4 = arith.constant 0 : index
    %2 = vector.load %arg2[%c0_2, %c0_3, %c0_4] : memref<1x2x32xf32, #tpu.memory_space<vmem>>, vector<1x2x32xf32>
    %3 = vector.shape_cast %2 : vector<1x2x32xf32> to vector<2x32xf32>
    %c0_5 = arith.constant 0 : index
    %c0_6 = arith.constant 0 : index
    %4 = vector.load %arg3[%c0_5, %c0_6] : memref<73x128xf32, #tpu.memory_space<vmem>>, vector<32x128xf32>
    %c32 = arith.constant 32 : index
    %c0_7 = arith.constant 0 : index
    %5 = vector.load %arg3[%c32, %c0_7] : memref<73x128xf32, #tpu.memory_space<vmem>>, vector<32x128xf32>
    %cst = arith.constant dense<0.000000e+00> : vector<2x128xf32>
    %6 = tpu.matmul %1, %4, %cst {dimension_numbers = #tpu.dot_dimension_numbers<[1], [0], [0], [1], [0, 0, 1, 1], [], []>} : vector<2x32xf32>, vector<32x128xf32>, vector<2x128xf32> -> vector<2x128xf32>
    %cst_8 = arith.constant dense<0.000000e+00> : vector<2x128xf32>
    %7 = tpu.matmul %3, %5, %cst_8 {dimension_numbers = #tpu.dot_dimension_numbers<[1], [0], [0], [1], [0, 0, 1, 1], [], []>} : vector<2x32xf32>, vector<32x128xf32>, vector<2x128xf32> -> vector<2x128xf32>
    %8 = arith.addf %6, %7 : vector<2x128xf32>
    %c0_9 = arith.constant 0 : index
    %c0_10 = arith.constant 0 : index
    %9 = vector.load %arg4[%c0_9, %c0_10] : memref<10x32xf32, #tpu.memory_space<vmem>>, vector<8x32xf32>
    %cst_11 = arith.constant dense<0.000000e+00> : vector<2x8xf32>
    %10 = tpu.matmul %1, %9, %cst_11 {dimension_numbers = #tpu.dot_dimension_numbers<[1], [1], [0], [0], [0, 0, 1, 0], [], []>} : vector<2x32xf32>, vector<8x32xf32>, vector<2x8xf32> -> vector<2x8xf32>
    %cst_12 = arith.constant 0.176776692 : f32
    %11 = vector.broadcast %cst_12 : f32 to vector<2x8xf32>
    %12 = arith.mulf %10, %11 : vector<2x8xf32>
    %cst_13 = arith.constant dense<0xFF800000> : vector<2xf32>
    %13 = vector.multi_reduction <maximumf>, %12, %cst_13 [1] : vector<2x8xf32> to vector<2xf32>
    %14 = vector.shape_cast %13 : vector<2xf32> to vector<2x1xf32>
    %15 = vector.broadcast %14 : vector<2x1xf32> to vector<2x8xf32>
    %16 = arith.subf %12, %15 : vector<2x8xf32>
    %17 = math.exp %16 : vector<2x8xf32>
    %cst_14 = arith.constant dense<0.000000e+00> : vector<2xf32>
    %18 = vector.multi_reduction <add>, %17, %cst_14 [1] : vector<2x8xf32> to vector<2xf32>
    %19 = vector.shape_cast %18 : vector<2xf32> to vector<2x1xf32>
    %20 = vector.broadcast %19 : vector<2x1xf32> to vector<2x8xf32>
    %21 = arith.divf %17, %20 : vector<2x8xf32>
    %c64 = arith.constant 64 : index
    %c0_15 = arith.constant 0 : index
    %22 = vector.load %arg3[%c64, %c0_15] : memref<73x128xf32, #tpu.memory_space<vmem>>, vector<8x128xf32>
    %c72 = arith.constant 72 : index
    %c0_16 = arith.constant 0 : index
    %23 = vector.load %arg3[%c72, %c0_16] : memref<73x128xf32, #tpu.memory_space<vmem>>, vector<1x128xf32>
    %cst_17 = arith.constant dense<0.000000e+00> : vector<2x128xf32>
    %24 = tpu.matmul %21, %22, %cst_17 {dimension_numbers = #tpu.dot_dimension_numbers<[1], [0], [0], [1], [0, 0, 1, 1], [], []>} : vector<2x8xf32>, vector<8x128xf32>, vector<2x128xf32> -> vector<2x128xf32>
    %25 = arith.addf %8, %24 : vector<2x128xf32>
    %26 = vector.broadcast %23 : vector<1x128xf32> to vector<2x128xf32>
    %27 = arith.addf %25, %26 : vector<2x128xf32>
    %28 = vector.extract_strided_slice %27 {offsets = [0, 0], sizes = [2, 32], strides = [1, 1]} : vector<2x128xf32> to vector<2x32xf32>
    %29 = arith.negf %28 : vector<2x32xf32>
    %30 = math.exp %29 : vector<2x32xf32>
    %cst_18 = arith.constant 1.000000e+00 : f32
    %31 = vector.broadcast %cst_18 : f32 to vector<2x32xf32>
    %32 = arith.addf %31, %30 : vector<2x32xf32>
    %33 = arith.divf %31, %32 : vector<2x32xf32>
    %34 = vector.extract_strided_slice %27 {offsets = [0, 32], sizes = [2, 32], strides = [1, 1]} : vector<2x128xf32> to vector<2x32xf32>
    %35 = arith.negf %34 : vector<2x32xf32>
    %36 = math.exp %35 : vector<2x32xf32>
    %cst_19 = arith.constant 1.000000e+00 : f32
    %37 = vector.broadcast %cst_19 : f32 to vector<2x32xf32>
    %38 = arith.addf %37, %36 : vector<2x32xf32>
    %39 = arith.divf %37, %38 : vector<2x32xf32>
    %40 = vector.extract_strided_slice %27 {offsets = [0, 64], sizes = [2, 32], strides = [1, 1]} : vector<2x128xf32> to vector<2x32xf32>
    %41 = vector.extract_strided_slice %27 {offsets = [0, 96], sizes = [2, 32], strides = [1, 1]} : vector<2x128xf32> to vector<2x32xf32>
    %42 = arith.mulf %33, %41 : vector<2x32xf32>
    %43 = arith.addf %40, %42 : vector<2x32xf32>
    %44 = math.tanh %43 : vector<2x32xf32>
    %cst_20 = arith.constant 1.000000e+00 : f32
    %45 = vector.broadcast %cst_20 : f32 to vector<2x32xf32>
    %46 = arith.subf %45, %39 : vector<2x32xf32>
    %47 = arith.mulf %46, %44 : vector<2x32xf32>
    %48 = arith.mulf %39, %3 : vector<2x32xf32>
    %49 = arith.addf %47, %48 : vector<2x32xf32>
    %c0_21 = arith.constant 0 : index
    %c0_22 = arith.constant 0 : index
    %c0_23 = arith.constant 0 : index
    %50 = vector.load %arg5[%c0_21, %c0_22, %c0_23] : memref<1x3x32xf32, #tpu.memory_space<vmem>>, vector<1x2x32xf32>
    %51 = vector.shape_cast %50 : vector<1x2x32xf32> to vector<2x32xf32>
    %52 = vector.shape_cast %49 : vector<2x32xf32> to vector<1x2x32xf32>
    tpu.vector_store %arg5[%c0_21, %c0_22, %c0_23], %52 {strides = array<i32>} : memref<1x3x32xf32, #tpu.memory_space<vmem>>, vector<1x2x32xf32>,
    %c8 = arith.constant 8 : index
    %c0_24 = arith.constant 0 : index
    %53 = vector.load %arg4[%c8, %c0_24] : memref<10x32xf32, #tpu.memory_space<vmem>>, vector<1x32xf32>
    %c9 = arith.constant 9 : index
    %c0_25 = arith.constant 0 : index
    %54 = vector.load %arg4[%c9, %c0_25] : memref<10x32xf32, #tpu.memory_space<vmem>>, vector<1x1xf32>
    %55 = vector.broadcast %53 : vector<1x32xf32> to vector<2x32xf32>
    %56 = arith.mulf %1, %55 : vector<2x32xf32>
    %cst_26 = arith.constant dense<0.000000e+00> : vector<2xf32>
    %57 = vector.multi_reduction <add>, %56, %cst_26 [1] : vector<2x32xf32> to vector<2xf32>
    %58 = vector.shape_cast %57 : vector<2xf32> to vector<2x1xf32>
    %59 = vector.broadcast %54 : vector<1x1xf32> to vector<2x1xf32>
    %60 = arith.addf %58, %59 : vector<2x1xf32>
    %61 = vector.shape_cast %60 : vector<2x1xf32> to vector<1x2x1xf32>
    %cst_27 = arith.constant dense<0.000000e+00> : vector<1xf32>
    %62 = vector.multi_reduction <add>, %61, %cst_27 [1, 2] : vector<1x2x1xf32> to vector<1xf32>
    %63 = vector.shape_cast %62 : vector<1xf32> to vector<1x1x1xf32>
    %64 = vector.extract %63[0, 0, 0] : f32 from vector<1x1x1xf32>
    %65 = vector.broadcast %64 : f32 to vector<1x1xf32>
    %cst_28 = arith.constant 2.000000e+00 : f32
    %66 = vector.broadcast %cst_28 : f32 to vector<1x1xf32>
    %67 = arith.divf %65, %66 : vector<1x1xf32>
    %68 = arith.negf %67 : vector<1x1xf32>
    %69 = math.exp %68 : vector<1x1xf32>
    %cst_29 = arith.constant 1.000000e+00 : f32
    %70 = vector.broadcast %cst_29 : f32 to vector<1x1xf32>
    %71 = arith.addf %70, %69 : vector<1x1xf32>
    %72 = arith.divf %70, %71 : vector<1x1xf32>
    %73 = vector.shape_cast %72 : vector<1x1xf32> to vector<1x1xf32>
    %74 = vector.broadcast %73 : vector<1x1xf32> to vector<1x32xf32>
    %c0_30 = arith.constant 0 : index
    %c2 = arith.constant 2 : index
    %c0_31 = arith.constant 0 : index
    %75 = vector.load %arg5[%c0_30, %c2, %c0_31] : memref<1x3x32xf32, #tpu.memory_space<vmem>>, vector<1x1x32xf32>
    %76 = vector.shape_cast %75 : vector<1x1x32xf32> to vector<1x32xf32>
    %77 = vector.shape_cast %74 : vector<1x32xf32> to vector<1x1x32xf32>
    tpu.vector_store %arg5[%c0_30, %c2, %c0_31], %77 {strides = array<i32>} : memref<1x3x32xf32, #tpu.memory_space<vmem>>, vector<1x1x32xf32>,
    return
  }
  func.func @transform_0(%arg0: i32) -> (i32, i32, i32) {
    %c0_i32 = arith.constant 0 : i32
    %c0_i32_0 = arith.constant 0 : i32
    %c0_i32_1 = arith.constant 0 : i32
    return %arg0, %c0_i32, %c0_i32_0 : i32, i32, i32
  }
  func.func @transform_1(%arg0: i32) -> (i32, i32, i32) {
    %c0_i32 = arith.constant 0 : i32
    %c0_i32_0 = arith.constant 0 : i32
    %c0_i32_1 = arith.constant 0 : i32
    return %arg0, %c0_i32, %c0_i32_0 : i32, i32, i32
  }
  func.func @transform_2(%arg0: i32) -> (i32, i32) {
    %c0_i32 = arith.constant 0 : i32
    %c0_i32_0 = arith.constant 0 : i32
    %c0_i32_1 = arith.constant 0 : i32
    return %c0_i32, %c0_i32_0 : i32, i32
  }
  func.func @transform_3(%arg0: i32) -> (i32, i32) {
    %c0_i32 = arith.constant 0 : i32
    %c0_i32_0 = arith.constant 0 : i32
    %c0_i32_1 = arith.constant 0 : i32
    return %c0_i32, %c0_i32_0 : i32, i32
  }
  func.func @transform_4(%arg0: i32) -> (i32, i32, i32) {
    %c0_i32 = arith.constant 0 : i32
    %c0_i32_0 = arith.constant 0 : i32
    %c0_i32_1 = arith.constant 0 : i32
    return %arg0, %c0_i32, %c0_i32_0 : i32, i32, i32
  }
}

</mosaic_0001>

<bundles_post_ra>
// kernel: _forward_batched.1
= control target key start
LH: loop header
LB: loop body
LE: loop exit
PB: predicated region body
PF: predicated region fallthrough
CT: control target
= control target key end

     0   :  { %9 = vsyncpa [#allocation3], 0  ;;  %s521_s0 = inlined_call_operand.hbm [shape: f32[1,2,32], index: 0, kind: input, shape index: {}]   ;;  %s522_s1 = inlined_call_operand.hbm [shape: f32[1,2,32], index: 1, kind: input, shape index: {}]   ;;  %s523_s2 = inlined_call_operand.hbm [shape: f32[73,128], index: 2, kind: input, shape index: {}]   ;;  %s524_s3 = inlined_call_operand.hbm [shape: f32[10,32], index: 3, kind: input, shape index: {}]   ;;  %s525_s4 = inlined_call_operand.vmem [shape: f32[1,3,32], index: 4, kind: output, shape index: {}]  }
   0x1   :  { %10 = vsyncpa [#allocation5], 0  ;;  %s28_s17 = sshll.u32 %s522_s1, 4  ;;  %s29_s17 = int_to_ptr.hbm [resolvable:$true] %s28_s17 }
   0x2   :  { %11 = vsyncpa [#allocation8], 0  ;;  %s456_s18 = smov [#allocation4]   ;;  %s17_s22 = sshll.u32 %s521_s0, 4  ;;  %s18_s22 = int_to_ptr.hbm [resolvable:$true] %s17_s22 }
   0x3   :  { %s30_s19 = sshll.u32 %s456_s18, 4  ;;  %s457_s23 = smov [#allocation2]   ;;  %s31_s19 = int_to_ptr.vmem [resolvable:$true] %s30_s19 }
   0x4   :  { %33 = dma.hbm_to_vmem [thread:$0]  %s29_s17, 32, %s31_s19, [#allocation5]  }
   0x5   :  { %s19_s24 = sshll.u32 %s457_s23, 4  ;;  %s38_s27 = sshll.u32 %s523_s2, 4  ;;  %s20_s24 = int_to_ptr.vmem [resolvable:$true] %s19_s24  ;;  %s39_s27 = int_to_ptr.hbm [resolvable:$true] %s38_s27 }
   0x6   :  { %22 = dma.hbm_to_vmem [thread:$0]  %s18_s22, 32, %s20_s24, [#allocation3]  }
   0x7   :  { %s458_s1 = smov [#allocation6]   ;;  %s51_s5 = sshll.u32 %s524_s3, 4  ;;  %s52_s5 = int_to_ptr.hbm [resolvable:$true] %s51_s5 }
   0x8   :  { %s40_s28 = sshll.u32 %s458_s1, 4  ;;  %s459_s6 = smov 128   ;;  %s41_s28 = int_to_ptr.vmem [resolvable:$true] %s40_s28 }
   0x9   :  { %s460_s0 = smov 8   ;;  %s461_s7 = smov [#allocation7]  }
   0xa   :  { %46 = dma.hbm_to_vmem [thread:$0]  %s39_s27, 1280, %s41_s28, [#allocation5], %s459_s6, %s459_s6, %s460_s0  }
   0xb   :  { %s53_s8 = sshll.u32 %s461_s7, 4  ;;  %s54_s8 = int_to_ptr.vmem [resolvable:$true] %s53_s8 }
   0xc   :  { %59 = dma.hbm_to_vmem [thread:$0]  %s52_s5, 256, %s54_s8, [#allocation8], %s459_s6, %s459_s6, %s460_s0  }
   0xd   :  { %450 = dma.done.wait [#allocation3], 32  }
   0xe   :  { %451 = vsyncadd [#allocation3], 4294967264 }
   0xf   :  { %452 = dma.done.wait [#allocation5], 1312  }
  0x10   :  { %453 = vsyncadd [#allocation5], 4294965984 }
  0x11   :  { %454 = dma.done.wait [#allocation8], 256  }
  0x12   :  { %455 = vsyncadd [#allocation8], 4294967040  ;;  %vm86_vm0 = vcmask 261120   ;;  %v133_v0 = vld [vmem:[#allocation7] sm:$0xff]  ;;  %v76_v1 = vld [vmem:[#allocation2] sm:$0x3] }
  0x13   :  { %318 = vmatpush.xpose.msk.msra.mxu2 %vm86_vm0, %v133_v0  ;;  %vm158_vm1 = vcmask 58368   ;;  %v85_v10 = vld [vmem:[#allocation6 + $0x38] sm:$0xff]  ;;  %v84_v12 = vld [vmem:[#allocation6 + $0x30] sm:$0xff]  ;;  %v183_v14 = vld [vmem:[#allocation6 + $0x40] sm:$0xff]  ;;  %vm257_vm2 = vcmask 254976   ;;  %vm185_vm7 = vcmask 64512  }
  0x14   :  { %v81_v11 = vld [vmem:[#allocation6 + $0x18] sm:$0xff]  ;;  %102 = vmatpush.msra.mxu0 %v85_v10  ;;  %v80_v13 = vld [vmem:[#allocation6 + $0x10] sm:$0xff]  ;;  %204 = vmatpush.msra.mxu3 %v183_v14  ;;  %v83_v15 = vld [vmem:[#allocation6 + $0x28] sm:$0xff]  ;;  %vm268_vm8 = vcmask 1024   ;;  %s462_s2 = smov 32   ;;  %s463_s3 = smov 64  }
  0x15   :  { %125 = vmatpush.msra.mxu1 %v81_v11  ;;  %v79_v16 = vld [vmem:[#allocation6 + $0x8] sm:$0xff]  ;;  %v82_v17 = vld [vmem:[#allocation6 + $0x20] sm:$0xff]  ;;  %v505_v19 = vld [vmem:[#allocation4] sm:$0x3]  ;;  %s465_s10 = smov 96  }
  0x16   :  { %319 = vmatmul.msk.f32.vlgmr.msra.gmra.mxu2 %vm86_vm0, %v76_v1  ;;  %103 = vmatpush.msra.mxu0 %v84_v12  ;;  %v78_v18 = vld [vmem:[#allocation6] sm:$0xff]  ;;  %v335_v20 = vld [vmem:[#allocation7 + $0x8] ss:$0 sm:$0xff]  ;;  %v337_v35 = vld [vmem:[#allocation7 + $0x9] ss:$0 sm:$0xff] }
  0x17   :  { %126 = vmatpush.msra.mxu1 %v80_v13  ;;  %v262_v21 = vmul.f32 %v335_v20, %v76_v1  ;;  %v336_v42 = vld [vmem:[#allocation6 + $0x48] ss:$0 sm:$0xff] }
  0x18   :  { %104 = vmatpush.msra.mxu0 %v83_v15 }
  0x19   :  { %127 = vmatpush.msra.mxu1 %v79_v16  ;;  %v263_v22 = vsel %vm257_vm2, %v262_v21, 0.0 }
  0x1a   :  { %105 = vmatpush.msra.mxu0 %v82_v17  ;;  %264 = vadd.xlane.f32.xlu1 %v263_v22 }
  0x1b   :  { %128 = vmatpush.msra.mxu1 %v78_v18  ;;  %316 = vmatmul.msk.f32.vlgmr.msra.gmra.mxu0 %vm86_vm0, %v505_v19 }
  0x1c   :  { %317 = vmatmul.msk.f32.vlgmr.msra.gmra.mxu1 %vm86_vm0, %v76_v1 }
  0x8d   :  { %v265_v36 = vpop.xlane.xlu1 %264 }
  0x8e   :  { %v267_v37 = vadd.f32 %v337_v35, %v265_v36 }
  0x90   :  { %v269_v38 = vsel %vm268_vm8, %v267_v37, 0.0 }
  0x91   :  { %270 = vadd.xlane.f32.xlu2 %v269_v38 }
  0x98   :  { %v107_v39 = vpop.f32.mrf.mxu0 }
  0x99   :  { %v154_v2 = vpop.f32.mrf.mxu2  ;;  %v130_v40 = vpop.f32.mrf.mxu1 }
  0x9a   :  { %v157_v3 = vmul.f32 0.17677669, %v154_v2  ;;  %v131_v41 = vadd.f32 %v130_v40, %v107_v39 }
  0x9c   :  { %v159_v4 = vsel %vm158_vm1, %v157_v3, -inf }
  0x9d   :  { %160 = vmax.xlane.f32.xlu0 %v159_v4  ;;  %v464_v4 = vmov 2.0  }
 0x104   :  { %v271_v52 = vpop.xlane.xlu2 %270 }
 0x105   :  { %v272_v53 = vrot.slane %v271_v52, 4 }
 0x107   :  { %v273_v54 = vadd.f32 %v272_v53, %v271_v52 }
 0x109   :  { %v274_v56 = vrot.slane %v273_v54, 2 }
 0x10b   :  { %v275_v57 = vadd.f32 %v274_v56, %v273_v54 }
 0x10d   :  { %v276_v60 = vrot.slane %v275_v57, 1 }
 0x10f   :  { %v277_v62 = vadd.f32 %v276_v60, %v275_v57 }
 0x110   :  { %v161_v5 = vpop.xlane.xlu0 %160 }
 0x111   :  { %v162_v6 = vsub.f32 %v157_v3, %v161_v5  ;;  %323 = vpush %v277_v62 }
 0x113   :  { %v163_v7 = vmul.f32 1.442695, %v162_v6 }
 0x115   :  { %338 = vpow2.f32 %v163_v7 }
 0x11b   :  { %v339_v8 = vpop.eup %338 }
 0x11c   :  { %v165_v9 = vsel %vm158_vm1, %v339_v8, 0.0 }
 0x11d   :  { %166 = vadd.xlane.f32.xlu0 %v165_v9 }
 0x142   :  { %s324_s9 = spop %323 }
 0x143   :  { %v279_v9 = vstv %s324_s9 }
 0x190   :  { %v167_v23 = vpop.xlane.xlu0 %166 }
 0x191   :  { %340 = vrcp.f32 %v167_v23  ;;  %v179_v27 = vand.u32 2147483648, %v167_v23  ;;  %v177_v29 = vand.u32 2147483647, %v167_v23  ;;  %vm173_vm4 = vweird.f32 %v167_v23 }
 0x193   :  { %v180_v31 = vor.u32 1.1754944e-38, %v179_v27  ;;  %vm178_vm6 = vcmp.eq.f32.partialorder %v177_v29, 8.507059e+37 }
 0x197   :  { %v341_v24 = vpop.eup %340 }
 0x198   :  { %v169_v25 = vmul.f32 %v341_v24, %v167_v23  ;;  %vm174_vm3 = vweird.f32 %v341_v24 }
 0x199   :  { %vm175_vm5 = vmor %vm173_vm4, %vm174_vm3  ;;  %vm307_vm3 = vcmask 253952  }
 0x19a   :  { %v170_v26 = vsub.f32 1.0, %v169_v25 }
 0x19c   :  { %v171_v28 = vmul.f32 %v341_v24, %v170_v26 }
 0x19e   :  { %v172_v30 = vadd.f32 %v341_v24, %v171_v28 }
 0x1a0   :  { %v176_v32 = vsel %vm175_vm5, %v341_v24, %v172_v30 }
 0x1a1   :  { %v181_v33 = vsel %vm178_vm6, %v180_v31, %v176_v32 }
 0x1a2   :  { %v182_v34 = vmul.f32 %v339_v8, %v181_v33 }
 0x1a4   :  { %320 = vmatmul.msk.f32.vlgmr.msra.gmra.mxu3 %vm185_vm7, %v182_v34 }
 0x227   :  { %v206_v43 = vpop.f32.mrf.mxu3 }
 0x228   :  { %v209_v44 = vadd.f32 %v206_v43, %v131_v41 }
 0x22a   :  { %v211_v45 = vadd.f32 %v336_v42, %v209_v44 }
 0x22c   :  { %232 = vrot.lane.b32.xlu1 %v211_v45, %s462_s2  ;;  %v321_v46 = vmul.f32 -1.442695, %v211_v45 }
 0x22e   :  { %342 = vpow2.f32 %v321_v46 }
 0x234   :  { %v343_v47 = vpop.eup %342 }
 0x235   :  { %v215_v48 = vadd.f32 1.0, %v343_v47 }
 0x237   :  { %344 = vrcp.f32 %v215_v48  ;;  %v227_v59 = vand.u32 2147483648, %v215_v48  ;;  %vm221_vm10 = vweird.f32 %v215_v48  ;;  %v225_v61 = vand.u32 2147483647, %v215_v48 }
 0x238   :  { %346 = vrcp.f32 %v464_v4 }
 0x239   :  { %v228_v0 = vor.u32 1.1754944e-38, %v227_v59  ;;  %vm226_vm12 = vcmp.eq.f32.partialorder %v225_v61, 8.507059e+37 }
 0x23d   :  { %v345_v49 = vpop.eup %344 }
 0x23e   :  { %v217_v50 = vmul.f32 %v345_v49, %v215_v48  ;;  %vm222_vm9 = vweird.f32 %v345_v49  ;;  %v347_v5 = vpop.eup %346 }
 0x23f   :  { %vm223_vm11 = vmor %vm221_vm10, %vm222_vm9  ;;  %v281_v6 = vmul.f32 2.0, %v347_v5  ;;  %vm285_vm13 = vweird.f32 %v347_v5 }
 0x240   :  { %v218_v51 = vsub.f32 1.0, %v217_v50 }
 0x241   :  { %v282_v7 = vsub.f32 1.0, %v281_v6 }
 0x242   :  { %v219_v55 = vmul.f32 %v345_v49, %v218_v51 }
 0x243   :  { %v283_v8 = vmul.f32 %v347_v5, %v282_v7 }
 0x244   :  { %v220_v58 = vadd.f32 %v345_v49, %v219_v55 }
 0x245   :  { %v284_v10 = vadd.f32 %v347_v5, %v283_v8 }
 0x246   :  { %v224_v63 = vsel %vm223_vm11, %v345_v49, %v220_v58 }
 0x247   :  { %v229_v2 = vsel %vm226_vm12, %v228_v0, %v224_v63  ;;  %v286_v11 = vsel %vm285_vm13, %v347_v5, %v284_v10 }
 0x248   :  { %v287_v12 = vmul.f32 %v286_v11, %v279_v9  ;;  %v242_v30 = vsub.f32 1.0, %v229_v2 }
 0x24a   :  { %v322_v13 = vmul.f32 -1.442695, %v287_v12 }
 0x24c   :  { %348 = vpow2.f32 %v322_v13 }
 0x252   :  { %v349_v16 = vpop.eup %348 }
 0x253   :  { %v291_v17 = vadd.f32 1.0, %v349_v16 }
 0x255   :  { %v303_v21 = vand.u32 2147483648, %v291_v17  ;;  %vm297_vm14 = vweird.f32 %v291_v17  ;;  %v301_v23 = vand.u32 2147483647, %v291_v17 }
 0x257   :  { %v304_v25 = vor.u32 1.1754944e-38, %v303_v21  ;;  %vm302_vm1 = vcmp.eq.f32.partialorder %v301_v23, 8.507059e+37 }
 0x29e   :  { %v233_v1 = vpop.permute.xlu1 %232 }
 0x29f   :  { %v235_v3 = vmul.f32 %v233_v1, %v229_v2 }
 0x2a1   :  { %237 = vrot.lane.b32.xlu2 %v235_v3, %s463_s3 }
 0x2a9   :  { %248 = vrot.lane.b32.xlu2 %v505_v19, %s462_s2 }
 0x2fb   :  { %v238_v14 = vpop.permute.xlu2 %237 }
 0x2fc   :  { %v240_v15 = vadd.f32 %v238_v14, %v211_v45 }
 0x2fe   :  { %350 = vtanh.f32 %v240_v15 }
 0x2ff   :  { %352 = vrcp.f32 %v291_v17 }
 0x303   :  { %v249_v29 = vpop.permute.xlu2 %248 }
 0x304   :  { %v351_v18 = vpop.eup %350  ;;  %v251_v32 = vmul.f32 %v249_v29, %v229_v2 }
 0x305   :  { %244 = vrot.lane.b32.xlu0 %v351_v18, %s465_s10  ;;  %v353_v19 = vpop.eup %352 }
 0x306   :  { %v293_v20 = vmul.f32 %v353_v19, %v291_v17  ;;  %vm298_vm15 = vweird.f32 %v353_v19 }
 0x307   :  { %vm299_vm0 = vmor %vm297_vm14, %vm298_vm15 }
 0x308   :  { %v294_v22 = vsub.f32 1.0, %v293_v20 }
 0x30a   :  { %v295_v24 = vmul.f32 %v353_v19, %v294_v22 }
 0x30c   :  { %v296_v26 = vadd.f32 %v353_v19, %v295_v24 }
 0x30e   :  { %v300_v27 = vsel %vm299_vm0, %v353_v19, %v296_v26 }
 0x30f   :  { %v305_v28 = vsel %vm302_vm1, %v304_v25, %v300_v27 }
 0x310   :  { %308 = vst.msk [vmem:[%s525_s4 + $0x2] sm:$0x1] %vm307_vm3, %v305_v28 }
 0x377   :  { %v245_v31 = vpop.permute.xlu0 %244 }
 0x378   :  { %v247_v33 = vmul.f32 %v245_v31, %v242_v30 }
 0x37a   :  { %v252_v34 = vadd.f32 %v251_v32, %v247_v33 }
 0x37c   :  { %254 = vrot.lane.b32.xlu1 %v252_v34, %s465_s10 }
 0x3ee   :  { %v255_v35 = vpop.permute.xlu1 %254 }
 0x3ef   :  { %258 = vst.msk [vmem:[%s525_s4] sm:$0x3] %vm257_vm2, %v255_v35 }
 0x3f0   :  { %313 = vsyncpa [#allocation3], 1 }
 0x3f1   :  { %314 = vsyncpa [#allocation5], 1 }
 0x3f2   :  { %315 = vsyncpa [#allocation8], 1 }

</bundles_post_ra>
